<compile_context>
chip_gen: v6e
topology: v6e:2x2x1
jax: 0.10.0
libtpu: 0.0.40
codegen_flags: <defaults>
</compile_context>

<pallas_src>
import functools

import jax
import jax.numpy as jnp
from jax.experimental import pallas as pl
from jax.experimental.pallas import tpu as pltpu


def _cdiv(a, b):
    return -(-a // b)


def _entropy_kernel(x_ref, o_ref, *, hw, t_hw, n_t, n_tiles, needs_mask):
    # grid = (B, n_chunks, n_t):
    #   axis 0 = batch rows        (parallel)
    #   axis 1 = HW super-chunks   (parallel; distinct output slab per chunk)
    #   axis 2 = column tiles      (arbitrary reduction; output block constant
    #                               along it -> resident accumulator)
    c = pl.program_id(1)
    t = pl.program_id(2)

    @pl.when(t == 0)
    def _():
        o_ref[...] = jnp.zeros_like(o_ref)

    x = x_ref[...].astype(jnp.float32)                  # (1, C, t_hw)

    # Softmax over channels (axis=1, the second-minor / sublane axis).
    m = jnp.max(x, axis=1, keepdims=True)               # (1, 1, t_hw)
    s = x - m                                           # shifted logits
    e = jnp.exp(s)                                      # exp(x - max)   [EUP]
    z = jnp.sum(e, axis=1, keepdims=True)               # partition fn
    es = jnp.sum(e * s, axis=1, keepdims=True)          # sum_c e_c * s_c

    # sum_c p*logp per column = sum_c(e*s)/z - log(z)   (since sum_c p = 1)
    contrib = (es / z - jnp.log(z)).reshape(o_ref.shape)  # (1, 1, 1, t_hw)

    if needs_mask:
        gtile = c * n_t + t                             # global tile index
        is_tail = gtile >= n_tiles - 1                  # partial tail / OOB

        @pl.when(jnp.logical_not(is_tail))
        def _():
            o_ref[...] += contrib                       # interior: no mask work

        @pl.when(is_tail)
        def _():
            col = (jax.lax.broadcasted_iota(jnp.int32, o_ref.shape, 3)
                   + gtile * t_hw)
            o_ref[...] += jnp.where(col < hw, contrib, 0.0)
    else:
        o_ref[...] += contrib


def entropy_loss(x, *, max_block_bytes=8 * 1024 * 1024, min_parallel_items=4):
    """x: (B, C, H, W) logits (NCHW). Returns scalar entropy (f32)."""
    B, C, H, W = x.shape
    hw = H * W
    x3 = x.reshape(B, C, hw)                            # free reshape, no transpose
    itemsize = jnp.dtype(x.dtype).itemsize

    # ---- Tile sizing (includes sublane padding of C and of the output) -----
    sublane = max(8, 32 // itemsize)                    # 8 f32, 16 bf16, 32 i8/fp8
    c_pad = _cdiv(C, sublane) * sublane
    bytes_per_col_in = c_pad * itemsize                 # padded input bytes/col
    bytes_per_col_out = 8 * 4                           # (1,t_hw) f32 out pads to 8 rows
    bytes_per_col = bytes_per_col_in + bytes_per_col_out

    max_cols = (max_block_bytes // bytes_per_col) // 128 * 128
    if max_cols < 128:
        # Very large C: even a 128-lane tile exceeds the budget; emit it and
        # raise the scoped-VMEM limit below.
        # TODO(synk): add C-tiling (streamed max/sum over C) for huge C.
        max_cols = 128
    t_hw = hw if hw <= max_cols else max_cols
    n_tiles = _cdiv(hw, t_hw)

    # ---- Parallel chunk axis (v7x megacore; free on single-TC chips) -------
    if B >= min_parallel_items or n_tiles == 1:
        n_chunks = 1
    else:
        n_chunks = min(n_tiles, _cdiv(min_parallel_items, B))
    n_t = _cdiv(n_tiles, n_chunks)                      # tiles per chunk
    n_chunks = _cdiv(n_tiles, n_t)                      # drop fully-empty chunks

    needs_mask = (n_chunks * n_t * t_hw) != hw          # any OOB columns?
    has_oob_tiles = (n_chunks * n_t) > n_tiles          # fully-OOB steps exist?

    if has_oob_tiles:
        # Clamp the read for fully-OOB steps; their contrib is masked to 0.
        def in_map(b, c, t):
            return (b, 0, jnp.minimum(c * n_t + t, n_tiles - 1))
    else:
        def in_map(b, c, t):
            return (b, 0, c * n_t + t)

    # ---- VMEM accounting & compiler params ----------------------------------
    in_block = c_pad * itemsize * t_hw                  # one input buffer
    out_block = 8 * 4 * t_hw                            # one padded output buffer
    vmem_needed = 2 * (in_block + out_block) + (2 << 20)  # double-buffer + slack
    compiler_kwargs = dict(
        dimension_semantics=("parallel", "parallel", "arbitrary"),
    )
    if vmem_needed > 14 * 1024 * 1024:                  # beyond v5e's 16 MiB default
        compiler_kwargs["vmem_limit_bytes"] = int(min(vmem_needed, 64 << 20))

    total_elems = B * C * hw                            # PyTorch .mean() over ALL elems
    cost = pl.CostEstimate(
        flops=5 * total_elems,
        transcendentals=total_elems + B * hw,           # exp per elem + log per col
        bytes_accessed=total_elems * itemsize + B * n_chunks * t_hw * 4,
    )

    kernel = functools.partial(
        _entropy_kernel,
        hw=hw, t_hw=t_hw, n_t=n_t, n_tiles=n_tiles, needs_mask=needs_mask,
    )

    partials = pl.pallas_call(
        kernel,
        out_shape=jax.ShapeDtypeStruct((B, n_chunks, 1, t_hw), jnp.float32),
        grid_spec=pltpu.PrefetchScalarGridSpec(
            num_scalar_prefetch=0,
            grid=(B, n_chunks, n_t),
            in_specs=[pl.BlockSpec((1, C, t_hw), in_map)],
            out_specs=pl.BlockSpec((1, 1, 1, t_hw),
                                   lambda b, c, t: (b, c, 0, 0)),
        ),
        compiler_params=pltpu.CompilerParams(**compiler_kwargs),
        cost_estimate=cost,
    )(x3)

    # Tiny final reduction of the lane-dense partial slabs + mean / negate.
    return -(jnp.sum(partials) / jnp.float32(total_elems))


def entropy_loss_ref(x):
    """Pure-JAX reference matching the PyTorch module."""
    x = x.astype(jnp.float32)
    logp = jax.nn.log_softmax(x, axis=1)
    p = jax.nn.softmax(x, axis=1)
    return -jnp.mean(p * logp)


if __name__ == "__main__":
    key = jax.random.PRNGKey(0)

    # Main check: small NCHW logits, single full-width tile, no masking.
    x = jax.random.normal(key, (2, 4, 16, 16), dtype=jnp.float32)
    out = jax.block_until_ready(entropy_loss(x))
    ref = entropy_loss_ref(x)
    assert jnp.allclose(out, ref, rtol=1e-5, atol=1e-6), (out, ref)

    # Secondary check: force small tiles so the tail-mask, parallel-chunk and
    # clamped-OOB-tile paths are exercised (B=1, hw=4900 -> 5 tiles, 3 chunks).
    x2 = jax.random.normal(jax.random.PRNGKey(0), (1, 4, 70, 70),
                           dtype=jnp.float32)
    out2 = jax.block_until_ready(entropy_loss(x2, max_block_bytes=64 * 1024))
    ref2 = entropy_loss_ref(x2)
    assert jnp.allclose(out2, ref2, rtol=1e-5, atol=1e-5), (out2, ref2)

    print("KERNEL_OK")
</pallas_src>

<mosaic_0001>
module attributes {stable_mosaic.version = 11 : i64} {
  func.func @_entropy_kernel(%arg0: i32, %arg1: i32, %arg2: i32, %arg3: memref<1x4x256xf32, #tpu.memory_space<vmem>>, %arg4: memref<1x1x1x256xf32, #tpu.memory_space<vmem>>) attributes {dimension_semantics = [#tpu.dimension_semantics<parallel>, #tpu.dimension_semantics<parallel>, #tpu.dimension_semantics<arbitrary>], iteration_bounds = array<i64: 2, 1, 1>, scalar_prefetch = 0 : i64, scratch_operands = 0 : i64, tpu.core_type = #tpu.core_type<tc>, window_params = [{transform_indices = @transform_0, window_bounds = array<i64: 1, 4, 256>}, {transform_indices = @transform_1, window_bounds = array<i64: 1, 1, 1, 256>}]} {
    %c0_i32 = arith.constant 0 : i32
    %0 = arith.cmpi eq, %arg2, %c0_i32 : i32
    %1 = arith.extui %0 : i1 to i32
    %c0_i32_0 = arith.constant 0 : i32
    %2 = arith.cmpi ne, %1, %c0_i32_0 : i32
    scf.if %2 {
      %cst_13 = arith.constant 0.000000e+00 : f32
      %21 = vector.broadcast %cst_13 : f32 to vector<1x1x1x256xf32>
      %c0_14 = arith.constant 0 : index
      %c0_15 = arith.constant 0 : index
      %c0_16 = arith.constant 0 : index
      %c0_17 = arith.constant 0 : index
      %22 = vector.load %arg4[%c0_14, %c0_15, %c0_16, %c0_17] : memref<1x1x1x256xf32, #tpu.memory_space<vmem>>, vector<1x1x1x256xf32>
      tpu.vector_store %arg4[%c0_14, %c0_15, %c0_16, %c0_17], %21 {strides = array<i32>} : memref<1x1x1x256xf32, #tpu.memory_space<vmem>>, vector<1x1x1x256xf32>,
    } else {
    }
    %c0 = arith.constant 0 : index
    %c0_1 = arith.constant 0 : index
    %c0_2 = arith.constant 0 : index
    %3 = vector.load %arg3[%c0, %c0_1, %c0_2] : memref<1x4x256xf32, #tpu.memory_space<vmem>>, vector<1x4x256xf32>
    %cst = arith.constant dense<0xFF800000> : vector<1x256xf32>
    %4 = vector.multi_reduction <maximumf>, %3, %cst [1] : vector<1x4x256xf32> to vector<1x256xf32>
    %5 = vector.shape_cast %4 : vector<1x256xf32> to vector<1x1x256xf32>
    %6 = vector.broadcast %5 : vector<1x1x256xf32> to vector<1x4x256xf32>
    %7 = arith.subf %3, %6 : vector<1x4x256xf32>
    %8 = math.exp %7 : vector<1x4x256xf32>
    %cst_3 = arith.constant dense<0.000000e+00> : vector<1x256xf32>
    %9 = vector.multi_reduction <add>, %8, %cst_3 [1] : vector<1x4x256xf32> to vector<1x256xf32>
    %10 = vector.shape_cast %9 : vector<1x256xf32> to vector<1x1x256xf32>
    %11 = arith.mulf %8, %7 : vector<1x4x256xf32>
    %cst_4 = arith.constant dense<0.000000e+00> : vector<1x256xf32>
    %12 = vector.multi_reduction <add>, %11, %cst_4 [1] : vector<1x4x256xf32> to vector<1x256xf32>
    %13 = vector.shape_cast %12 : vector<1x256xf32> to vector<1x1x256xf32>
    %14 = arith.divf %13, %10 : vector<1x1x256xf32>
    %15 = math.log %10 : vector<1x1x256xf32>
    %16 = arith.subf %14, %15 : vector<1x1x256xf32>
    %17 = vector.shape_cast %16 : vector<1x1x256xf32> to vector<1x1x1x256xf32>
    %c0_5 = arith.constant 0 : index
    %c0_6 = arith.constant 0 : index
    %c0_7 = arith.constant 0 : index
    %c0_8 = arith.constant 0 : index
    %18 = vector.load %arg4[%c0_5, %c0_6, %c0_7, %c0_8] : memref<1x1x1x256xf32, #tpu.memory_space<vmem>>, vector<1x1x1x256xf32>
    %19 = arith.addf %18, %17 : vector<1x1x1x256xf32>
    %c0_9 = arith.constant 0 : index
    %c0_10 = arith.constant 0 : index
    %c0_11 = arith.constant 0 : index
    %c0_12 = arith.constant 0 : index
    %20 = vector.load %arg4[%c0_9, %c0_10, %c0_11, %c0_12] : memref<1x1x1x256xf32, #tpu.memory_space<vmem>>, vector<1x1x1x256xf32>
    tpu.vector_store %arg4[%c0_9, %c0_10, %c0_11, %c0_12], %19 {strides = array<i32>} : memref<1x1x1x256xf32, #tpu.memory_space<vmem>>, vector<1x1x1x256xf32>,
    return
  }
  func.func @transform_0(%arg0: i32, %arg1: i32, %arg2: i32) -> (i32, i32, i32) {
    %c1_i32 = arith.constant 1 : i32
    %0 = arith.muli %arg1, %c1_i32 : i32
    %1 = arith.addi %0, %arg2 : i32
    %c0_i32 = arith.constant 0 : i32
    %c0_i32_0 = arith.constant 0 : i32
    return %arg0, %c0_i32, %1 : i32, i32, i32
  }
  func.func @transform_1(%arg0: i32, %arg1: i32, %arg2: i32) -> (i32, i32, i32, i32) {
    %c0_i32 = arith.constant 0 : i32
    %c0_i32_0 = arith.constant 0 : i32
    %c0_i32_1 = arith.constant 0 : i32
    return %arg0, %arg1, %c0_i32, %c0_i32_0 : i32, i32, i32, i32
  }
}

</mosaic_0001>

<bundles_post_ra>
// kernel: tpu_custom_call.1
= control target key start
LH: loop header
LB: loop body
LE: loop exit
PB: predicated region body
PF: predicated region fallthrough
CT: control target
= control target key end

     0   :  { %6 = vsyncpa [#allocation3], 0  ;;  %s746_s0 = inlined_call_operand.hbm [shape: f32[2,4,256], index: 0, kind: input, shape index: {}]   ;;  %s747_s1 = inlined_call_operand.hbm [shape: f32[2,1,1,256], index: 1, kind: output, shape index: {}]  }
   0x1   :  { %8 = vsyncpa [#allocation3 + $0x1], 0 }
   0x2   :  { %9 = vsyncpa [#allocation4], 0 }
   0x3   :  { %11 = vsyncpa [#allocation4 + $0x1], 0  ;;  %s589_s6 = smov 0   ;;  %s591_s7 = smov 0  }
   0x4   :  { %s593_s8 = smov 0   ;;  %s595_s9 = smov 0  }
   0x5   :  { %s597_s10 = smov 0   ;;  %s599_s11 = smov 0  }
   0x6 LB: > { %s373_s12 = sadd.s32 4294967295, %s573_s11   ;;  %s374_s13 = sadd.s32 4294967294, %s573_s11   ;;  %s573_s11 = sphi %s599_s11, %s17_s11   ;;  %s569_s10 = sphi %s597_s10, %s761_s10   ;;  %s565_s9 = sphi %s595_s9, %s760_s9   ;;  %s561_s8 = sphi %s593_s8, %s759_s8   ;;  %s557_s7 = sphi %s591_s7, %s758_s7   ;;  %s553_s6 = sphi %s589_s6, %s757_s6  }
   0x7   : > { %s36_s14 = sadd.s32 1, %s569_s10  ;;  %s47_s15 = sadd.s32 1, %s561_s8 }
   0x8   : > { %p38_p0 = scmp.ge.s32.totalorder %s36_s14, 2  ;;  %p54_p1 = scmp.ne.s32.totalorder %s561_s8, %s557_s7 }
   0x9   : > { %p55_p2 = scmp.eq.s32.totalorder %s573_s11, 0  ;;  %p60_p3 = scmp.ne.s32.totalorder %s557_s7, %s553_s6 }
   0xa   : > { %s763_s14 = smov (%p38_p0, %s36_s14), 0  ;;  %p61_p5 = scmp.eq.s32.totalorder %s373_s12, 0 }
   0xb   : > { %p630_p4 = por %p55_p2, %p54_p1  ;;  %s42_s17 = ssub.s32 %s569_s10, %s763_s14 }
   0xc   : > { %p86_p6 = scmp.eq.s32.totalorder %s373_s12, 1  ;;  %p45_p7 = scmp.eq.s32.totalorder %s42_s17, 0 }
   0xd   : > { %p636_p8 = por %p61_p5, %p60_p3  ;;  %p92_p10 = scmp.eq.s32.totalorder %s374_s13, 1 }
   0xe   : > { %p640_p9 = por %p86_p6, %p54_p1  ;;  %p402_p13 = scmp.lt.s32.totalorder %s573_s11, 2 }
   0xf   : > { %s645_s20 = scalar_select %p45_p7, %s561_s8, %s47_s15  }
  0x10   : > { %p647_p11 = por %p92_p10, %p60_p3  ;;  %s112_s22 = sand.u32 1, %s561_s8  }
  0x11   : > { %s377_s23 = sshll.u32 %s112_s22, 3  ;;  %s388_s24 = sshll.u32 %s569_s10, 7 }
  0x12   : > { %s751_s21 = scalar_select %p647_p11, 1, 0 }
  0x13   : > { %s125_s27 = scalar_lea.hbm %s746_s0, %s388_s24  ;;  %s116_s28 = scalar_lea.vmem [#allocation2], %s377_s23 }
  0x14   : > { %s127_s29 = sshll.u32 %s116_s28, 4  ;;  %p660_p0 = pnand %p402_p13, %p630_p4  ;;  %s128_s29 = int_to_ptr.vmem [resolvable:$true] %s127_s29 }
  0x15   : > { %p380_p1 = scmp.ge.s32.totalorder %s573_s11, 1  ;;  %p132_p2 = scmp.lt.s32.totalorder %s573_s11, 3 }
  0x16   : > { %s113_s2 = scalar_lea.sflag [#allocation3], %s112_s22  ;;  %p467_p3 = pneg %p660_p0 }
  0x17   : > { %s478_s3 = scalar_lea.vmem %s128_s29, 128  ;;  %s575_s4 = smov [#allocation2]  }
  0x18   : > { %p479_p5 = scmp.ne.s32.totalorder %s128_s29, %s478_s3  ;;  %s483_s5 = sshll.u32 %s575_s4, 4  ;;  %s484_s5 = int_to_ptr.vmem [resolvable:$false] %s483_s5 }
  0x19   : > { %s485_s12 = scalar_lea.vmem %s484_s5, 256  ;;  %p486_p10 = scmp.lt.s32.totalorder %s128_s29, %s484_s5 }
  0x1a   : > { %p481_p6 = pnand %p479_p5, %p467_p3  ;;  %p487_p12 = scmp.lt.s32.totalorder %s485_s12, %s478_s3 }
  0x1c   : > { %p482_p7 = pneg %p481_p6  ;;  %p488_p4 = por %p487_p12, %p486_p10 }
  0x1e   : > { %p489_p13 = pnand %p488_p4, %p482_p7 }
  0x20   : > { %492 = shalt.err (!%p489_p13)
}
  0x21   : > { %397 = dma.hbm_to_vmem [thread:$0]  (!%p660_p0), %s125_s27, 128, %s128_s29, %s113_s2  }
  0x22   : > { %p133_p11 = pnand %p380_p1, %p132_p2 }
  0x23   : > { %s675_s13 = sand.u32 (!%p133_p11), 1, %s557_s7  }
  0x24   : > { %136 = sbr.rel (%p133_p11) target bundleno = 133 (0x85), region = 24  ;;  %s381_s15 = sshll.u32 (!%p133_p11), %s675_s13, 3 }
  0x25   : > { %s139_s16 = scalar_lea.sflag (!%p133_p11), [#allocation3], %s675_s13  ;;  %s142_s17 = scalar_lea.vmem (!%p133_p11), [#allocation2], %s381_s15 }
  0x29   : > { %544 = dma.done.wait (%p636_p8), %s139_s16, 128  }
  0x2a   : > { %546 = vsyncadd (%p636_p8), %s139_s16, 4294967168  ;;  %s382_s22 = sshll.u32 %s675_s13, 1  ;;  %v167_v0 = vlaneseq  ;;  %v576_v2 = vmov 0.0   ;;  %vm176_vm1 = vcmask 1043456   ;;  %v172_v3 = vld [vmem:[%s142_s17] sm:$0xff]  ;;  %s389_s18 = sshll.u32 %s565_s9, 5 }
  0x2b   : > { %s689_s23 = scalar_lea.vmem [#allocation5], %s382_s22  ;;  %v174_v4 = vcombine.high %v172_v3, %v172_v3  ;;  %v177_v5 = vsel %vm176_vm1, %v172_v3, -inf  ;;  %v577_v53 = vmov 1966171168   ;;  %s283_s27 = scalar_lea.hbm %s747_s1, %s389_s18 }
  0x2c   : > { %vm685_vm0 = vcmp.lt.s32.totalorder %v167_v0, 256  ;;  %v178_v6 = vrot.slane %v177_v5, 4  ;;  %v248_v54 = vunpack.c.l.s4 %v577_v53  ;;  %v251_v62 = vshrl.u32 %v167_v0, 7  ;;  %s285_s24 = sshll.u32 %s689_s23, 4  ;;  %s269_s28 = scalar_lea.sflag [#allocation4], %s675_s13  ;;  %s286_s24 = int_to_ptr.vmem [resolvable:$true] %s285_s24 }
  0x2d   : > { %171 = vst.msk [vmem:[%s689_s23] sm:$0x3] %vm685_vm0, %v576_v2  ;;  %v184_v7 = vsel %vm176_vm1, %v174_v4, -inf  ;;  %s493_s29 = scalar_lea.vmem %s286_s24, 32  ;;  %s578_s30 = smov [#allocation5]  }
  0x2e   : > { %v179_v8 = vmax.f32 %v177_v5, %v178_v6  ;;  %v185_v9 = vrot.slane %v184_v7, 4  ;;  %v249_v61 = vunpack.c.0.s8 %v248_v54  ;;  %p494_p8 = scmp.ne.s32.totalorder %s286_s24, %s493_s29  ;;  %s497_s2 = sshll.u32 %s578_s30, 4  ;;  %s498_s2 = int_to_ptr.vmem [resolvable:$false] %s497_s2 }
  0x2f   : > { %s499_s9 = scalar_lea.vmem %s498_s2, 64  ;;  %p500_p0 = scmp.lt.s32.totalorder %s286_s24, %s498_s2 }
  0x30   : > { %v180_v10 = vrot.slane %v179_v8, 2  ;;  %v186_v11 = vmax.f32 %v184_v7, %v185_v9  ;;  %v252_v6 = vsub.s32 %v249_v61, %v251_v62  ;;  %p495_p11 = pnand %p494_p8, %p640_p9  ;;  %p501_p1 = scmp.lt.s32.totalorder %s499_s9, %s493_s29 }
  0x32   : > { %v181_v12 = vmax.f32 %v179_v8, %v180_v10  ;;  %v187_v13 = vrot.slane %v186_v11, 2  ;;  %p496_p12 = pneg %p495_p11  ;;  %p502_p2 = por %p501_p1, %p500_p0 }
  0x34   : > { %v182_v14 = vrot.slane %v181_v12, 1  ;;  %v188_v15 = vmax.f32 %v186_v11, %v187_v13  ;;  %v243_v9 = vld [vmem:[%s689_s23] sm:$0x3]  ;;  %p503_p3 = pnand %p502_p2, %p496_p12 }
  0x36   : > { %v183_v16 = vmax.f32 %v181_v12, %v182_v14  ;;  %v189_v17 = vrot.slane %v188_v15, 1 }
  0x38   : > { %v190_v18 = vmax.f32 %v188_v15, %v189_v17 }
  0x3a   : > { %v193_v19 = vcombine.low %v183_v16, %v190_v18 }
  0x3c   : > { %v195_v20 = vsub.f32 %v172_v3, %v193_v19 }
  0x3e   : > { %v196_v21 = vmul.f32 1.442695, %v195_v20 }
  0x40   : > { %455 = vpow2.f32 %v196_v21 }
  0x4d   : > { %v456_v22 = vpop.eup %455 }
  0x4e   : > { %v199_v23 = vcombine.high %v456_v22, %v456_v22  ;;  %v201_v24 = vsel %vm176_vm1, %v456_v22, 0.0  ;;  %v215_v25 = vmul.f32 %v456_v22, %v195_v20 }
  0x4f   : > { %v202_v26 = vrot.slane %v201_v24, 4 }
  0x50   : > { %v208_v27 = vsel %vm176_vm1, %v199_v23, 0.0  ;;  %v217_v28 = vcombine.high %v215_v25, %v215_v25  ;;  %v219_v29 = vsel %vm176_vm1, %v215_v25, 0.0 }
  0x51   : > { %v203_v30 = vadd.f32 %v202_v26, %v201_v24  ;;  %v209_v31 = vrot.slane %v208_v27, 4  ;;  %v220_v32 = vrot.slane %v219_v29, 4 }
  0x52   : > { %v226_v33 = vsel %vm176_vm1, %v217_v28, 0.0 }
  0x53   : > { %v204_v34 = vrot.slane %v203_v30, 2  ;;  %v210_v35 = vadd.f32 %v209_v31, %v208_v27  ;;  %v227_v36 = vrot.slane %v226_v33, 4  ;;  %v221_v39 = vadd.f32 %v220_v32, %v219_v29 }
  0x55   : > { %v205_v37 = vadd.f32 %v204_v34, %v203_v30  ;;  %v211_v38 = vrot.slane %v210_v35, 2  ;;  %v228_v42 = vadd.f32 %v227_v36, %v226_v33  ;;  %v222_v45 = vrot.slane %v221_v39, 2 }
  0x57   : > { %v206_v40 = vrot.slane %v205_v37, 1  ;;  %v212_v41 = vadd.f32 %v211_v38, %v210_v35  ;;  %v229_v47 = vrot.slane %v228_v42, 2  ;;  %v223_v48 = vadd.f32 %v222_v45, %v221_v39 }
  0x59   : > { %v207_v43 = vadd.f32 %v206_v40, %v205_v37  ;;  %v213_v44 = vrot.slane %v212_v41, 1  ;;  %v230_v49 = vadd.f32 %v229_v47, %v228_v42  ;;  %v224_v50 = vrot.slane %v223_v48, 1 }
  0x5b   : > { %v214_v46 = vadd.f32 %v213_v44, %v212_v41  ;;  %457 = vrcp.f32 %v207_v43  ;;  %v231_v51 = vrot.slane %v230_v49, 1  ;;  %v225_v52 = vadd.f32 %v224_v50, %v223_v48 }
  0x5c   : > { %459 = vlog2.f32 %v207_v43 }
  0x5d   : > { %461 = vrcp.f32 %v214_v46  ;;  %v232_v55 = vadd.f32 %v231_v51, %v230_v49 }
  0x5e   : > { %463 = vlog2.f32 %v214_v46 }
  0x68   : > { %v458_v56 = vpop.eup %457 }
  0x69   : > { %v460_v57 = vpop.eup %459  ;;  %v234_v58 = vmul.f32 %v458_v56, %v225_v52 }
  0x6a   : > { %v462_v59 = vpop.eup %461  ;;  %v238_v60 = vmul.f32 0.6931472, %v460_v57 }
  0x6b   : > { %v464_v63 = vpop.eup %463  ;;  %v236_v2 = vmul.f32 %v462_v59, %v232_v55 }
  0x6c   : > { %v240_v3 = vmul.f32 0.6931472, %v464_v63  ;;  %v241_v4 = vsub.f32 %v234_v58, %v238_v60 }
  0x6e   : > { %v242_v5 = vsub.f32 %v236_v2, %v240_v3 }
  0x70   : > { %v246_v7 = vcombine.low %v241_v4, %v242_v5 }
  0x72   : > { %v253_v8 = vrot.slane %v246_v7, %v252_v6 }
  0x74   : > { %v260_v10 = vrot.slane %v253_v8, %v252_v6 }
  0x76   : > { %v262_v11 = vadd.f32 %v260_v10, %v243_v9 }
  0x78   : > { %267 = vst.msk [vmem:[%s689_s23] sm:$0x3] %vm685_vm0, %v262_v11 }
  0x79   : > { %506 = shalt.err (!%p503_p3)
}
  0x7a   : > { %s507_s3 = scalar_lea.hbm %s283_s27, 32  ;;  %s511_s12 = scalar_lea.hbm %s747_s1, 64 }
  0x7b   : > { %p508_p5 = scmp.ne.s32.totalorder %s283_s27, %s507_s3  ;;  %p512_p10 = scmp.lt.s32.totalorder %s283_s27, %s747_s1 }
  0x7c   : > { %p513_p4 = scmp.lt.s32.totalorder %s511_s12, %s507_s3 }
  0x7d   : > { %p509_p6 = pnand %p508_p5, %p640_p9 }
  0x7e   : > { %p514_p13 = por %p513_p4, %p512_p10 }
  0x7f   : > { %p510_p7 = pneg %p509_p6 }
  0x81   : > { %p515_p8 = pnand %p514_p13, %p510_p7 }
  0x83   : > { %518 = shalt.err (!%p515_p8)
}
  0x84   : > { %392 = dma.vmem_to_hbm [thread:$0]  (%p640_p9), %s286_s24, 32, %s283_s27, %s269_s28  }
  0x85 PF: > { %s297_s16 = sand.u32 1, %s553_s6   ;;  %p755_p11 = scmp.ne.s32.totalorder %s751_s21, 0 }
  0x86   : > { %p756_p12 = scmp.ge.s32.totalorder %s573_s11, 2  ;;  %s298_s17 = scalar_lea.sflag [#allocation4], %s297_s16 }
  0x88   : > { %p399_p0 = pnand %p756_p12, %p755_p11 }
  0x8a   : > { %p400_p1 = pneg %p399_p0 }
  0x8c   : > { %548 = dma.done.wait (%p400_p1), %s298_s17, 32  }
  0x8d   : > { %550 = vsyncadd (%p400_p1), %s298_s17, 4294967264  ;;  %s17_s11 = sadd.s32 1, %s573_s11   ;;  %s757_s6 = smov %s557_s7 }
  0x8e   : > { %p14_p2 = scmp.ge.s32.totalorder %s17_s11, 4   ;;  %s758_s7 = smov %s561_s8 }
  0x8f   : > { %s759_s8 = smov %s645_s20  ;;  %s760_s9 = smov %s569_s10 }
  0x90   : > { %s761_s10 = smov %s763_s14  ;;  %16 = sbr.rel (!%p14_p2) target bundleno = 6 (0x6), region = 73 }
  0x95   :  { %303 = vsyncpa [#allocation3], 1 }
  0x96   :  { %305 = vsyncpa [#allocation3 + $0x1], 1 }
  0x97   :  { %306 = vsyncpa [#allocation4], 1 }
  0x98   :  { %308 = vsyncpa [#allocation4 + $0x1], 1 }

</bundles_post_ra>
